<compile_context>
chip_gen: v6e
topology: v6e:2x2x1
jax: 0.10.0
libtpu: 0.0.40
codegen_flags: <defaults>
</compile_context>

<pallas_src>
import jax
import jax.numpy as jnp
from jax.experimental import pallas as pl
from jax.experimental.pallas import tpu as pltpu

NEG_SLOPE = 0.01             # F.leaky_relu default negative slope
FEAT = 64                    # in/out features of fc1 / fc2
TB_MAX = 2048                # max rows per batch tile (2048*64*4B = 512 KiB/buffer)
MATMUL_DTYPE = jnp.bfloat16  # MXU-native; set to jnp.float32 for exact f32 parity


def _round_up(n, m):
    return ((n + m - 1) // m) * m


def nnet_kernel(x_ref, w1_ref, b1_ref, w2_ref, b2_ref, o_ref):
    # x tile: (TB, 64). f32 for the elementwise path (input may be bf16/f16),
    # MATMUL_DTYPE for the MXU (accumulation stays f32).
    x = x_ref[...].astype(jnp.float32)
    xm = x.astype(MATMUL_DTYPE)

    # fc1 + leaky_relu
    h1 = jnp.dot(xm, w1_ref[...], preferred_element_type=jnp.float32) + b1_ref[...]
    h1 = jnp.where(h1 > 0, h1, NEG_SLOPE * h1)

    # fc2 + leaky_relu
    h2 = jnp.dot(xm, w2_ref[...], preferred_element_type=jnp.float32) + b2_ref[...]
    h2 = jnp.where(h2 > 0, h2, NEG_SLOPE * h2)

    # score_b = sum_k x[b,k] * (h1[b,k] + h2[b,k])   -> (TB,)
    score = jnp.sum(x * (h1 + h2), axis=1)

    # Lane-dense store: one (1, TB) row per grid step (not a (TB, 1) column).
    o_ref[0, :] = jnp.tanh(score)


def nnet_forward(s, w1_t, b1, w2_t, b2):
    """s: any array whose size is a multiple of 64 (the module does view(-1, 64)).
    w1_t / w2_t: (in=64, out=64)  (transpose of the PyTorch nn.Linear weight).
    b1 / b2: (64,).  Returns a 1-D array of length s.size // 64."""
    x = s.reshape(-1, FEAT)          # no dtype cast here; cast per-tile in-kernel
    B = x.shape[0]

    # Batch tiling: tile rows are a multiple of 8 sublanes, at most TB_MAX.
    num_tiles = max(1, -(-B // TB_MAX))
    TB = _round_up(-(-B // num_tiles), 8)
    B_pad = num_tiles * TB
    if B_pad != B:
        # Zero rows -> score 0 -> tanh 0; they are sliced off below.
        x = jnp.pad(x, ((0, B_pad - B), (0, 0)))

    w1m = w1_t.astype(MATMUL_DTYPE)
    w2m = w2_t.astype(MATMUL_DTYPE)
    b1f = b1.reshape(1, FEAT).astype(jnp.float32)
    b2f = b2.reshape(1, FEAT).astype(jnp.float32)

    cost = pl.CostEstimate(
        flops=B_pad * (4 * FEAT * FEAT + 6 * FEAT),
        transcendentals=B_pad,
        bytes_accessed=(B_pad * FEAT * x.dtype.itemsize          # input
                        + B_pad * 4                              # output scores
                        + 2 * FEAT * FEAT * w1m.dtype.itemsize   # weights
                        + 2 * FEAT * 4),                         # biases
    )

    out = pl.pallas_call(
        nnet_kernel,
        out_shape=jax.ShapeDtypeStruct((num_tiles, TB), jnp.float32),
        grid=(num_tiles,),
        in_specs=[
            pl.BlockSpec((TB, FEAT), lambda i: (i, 0)),     # x: streamed per tile
            pl.BlockSpec((FEAT, FEAT), lambda i: (0, 0)),   # w1: VMEM-resident
            pl.BlockSpec((1, FEAT), lambda i: (0, 0)),      # b1: VMEM-resident
            pl.BlockSpec((FEAT, FEAT), lambda i: (0, 0)),   # w2: VMEM-resident
            pl.BlockSpec((1, FEAT), lambda i: (0, 0)),      # b2: VMEM-resident
        ],
        out_specs=pl.BlockSpec((1, TB), lambda i: (i, 0)),  # lane-dense score slab
        compiler_params=pltpu.CompilerParams(
            dimension_semantics=("parallel",),              # 2-TC sharding on v7x
        ),
        cost_estimate=cost,
    )(x, w1m, b1f, w2m, b2f)

    return out.reshape(-1)[:B]


def init_params(key):
    """nn.Linear(64, 64)-style shapes; weights kept pre-transposed as (in, out)."""
    k1, k2, k3, k4 = jax.random.split(key, 4)
    bound = 1.0 / jnp.sqrt(64.0)
    w1_t = jax.random.uniform(k1, (FEAT, FEAT), jnp.float32, -bound, bound)
    b1 = jax.random.uniform(k2, (FEAT,), jnp.float32, -bound, bound)
    w2_t = jax.random.uniform(k3, (FEAT, FEAT), jnp.float32, -bound, bound)
    b2 = jax.random.uniform(k4, (FEAT,), jnp.float32, -bound, bound)
    return w1_t, b1, w2_t, b2


def _reference(x, w1_t, b1, w2_t, b2, mm_dtype):
    """Pure-JAX reference; mm_dtype controls the matmul operand precision."""
    xf = x.astype(jnp.float32)
    h1 = jnp.dot(x.astype(mm_dtype), w1_t.astype(mm_dtype),
                 preferred_element_type=jnp.float32) + b1[None, :]
    h1 = jnp.where(h1 > 0, h1, NEG_SLOPE * h1)
    h2 = jnp.dot(x.astype(mm_dtype), w2_t.astype(mm_dtype),
                 preferred_element_type=jnp.float32) + b2[None, :]
    h2 = jnp.where(h2 > 0, h2, NEG_SLOPE * h2)
    return jnp.tanh(jnp.sum(xf * (h1 + h2), axis=1))


if __name__ == "__main__":
    key = jax.random.PRNGKey(0)
    pkey, xkey = jax.random.split(key)
    w1_t, b1, w2_t, b2 = init_params(pkey)

    # Any shape with size % 64 == 0; forward does view(-1, 64) -> 8 rows here.
    s = jax.random.normal(xkey, (2, 4, 64), dtype=jnp.float32)

    out = nnet_forward(s, w1_t, b1, w2_t, b2)
    out = jax.block_until_ready(out)
    assert out.shape == (8,)

    x = s.reshape(-1, FEAT)
    # Tight check against a reference that mirrors the kernel's bf16 MXU math.
    ref_kernel_math = _reference(x, w1_t, b1, w2_t, b2, MATMUL_DTYPE)
    assert jnp.allclose(out, ref_kernel_math, atol=1e-4, rtol=1e-3), (
        float(jnp.max(jnp.abs(out - ref_kernel_math))))
    # Loose check against the exact f32 module semantics (bf16 matmul rounding;
    # tanh output is in [-1, 1], worst-case propagated delta is well under 5e-2).
    ref_module_f32 = _reference(x, w1_t, b1, w2_t, b2, jnp.float32)
    assert jnp.allclose(out, ref_module_f32, atol=5e-2, rtol=5e-2), (
        float(jnp.max(jnp.abs(out - ref_module_f32))))

    print("KERNEL_OK")
</pallas_src>

<mosaic_0001>
module attributes {stable_mosaic.version = 11 : i64} {
  func.func @nnet_kernel(%arg0: i32, %arg1: memref<8x64xf32, #tpu.memory_space<vmem>>, %arg2: memref<64x64xbf16, #tpu.memory_space<vmem>>, %arg3: memref<1x64xf32, #tpu.memory_space<vmem>>, %arg4: memref<64x64xbf16, #tpu.memory_space<vmem>>, %arg5: memref<1x64xf32, #tpu.memory_space<vmem>>, %arg6: memref<1x8xf32, #tpu.memory_space<vmem>>) attributes {dimension_semantics = [#tpu.dimension_semantics<parallel>], iteration_bounds = array<i64: 1>, scalar_prefetch = 0 : i64, scratch_operands = 0 : i64, tpu.core_type = #tpu.core_type<tc>, window_params = [{transform_indices = @transform_0, window_bounds = array<i64: 8, 64>}, {pipeline_mode = #tpu.pipeline_mode<synchronous>, transform_indices = @transform_1, window_bounds = array<i64: 64, 64>}, {pipeline_mode = #tpu.pipeline_mode<synchronous>, transform_indices = @transform_2, window_bounds = array<i64: 1, 64>}, {pipeline_mode = #tpu.pipeline_mode<synchronous>, transform_indices = @transform_3, window_bounds = array<i64: 64, 64>}, {pipeline_mode = #tpu.pipeline_mode<synchronous>, transform_indices = @transform_4, window_bounds = array<i64: 1, 64>}, {transform_indices = @transform_5, window_bounds = array<i64: 1, 8>}]} {
    %c0 = arith.constant 0 : index
    %c0_0 = arith.constant 0 : index
    %0 = vector.load %arg1[%c0, %c0_0] : memref<8x64xf32, #tpu.memory_space<vmem>>, vector<8x64xf32>
    %1 = arith.truncf %0 : vector<8x64xf32> to vector<8x64xbf16>
    %c0_1 = arith.constant 0 : index
    %c0_2 = arith.constant 0 : index
    %2 = vector.load %arg2[%c0_1, %c0_2] : memref<64x64xbf16, #tpu.memory_space<vmem>>, vector<64x64xbf16>
    %cst = arith.constant dense<0.000000e+00> : vector<8x64xf32>
    %3 = tpu.matmul %1, %2, %cst {dimension_numbers = #tpu.dot_dimension_numbers<[1], [0], [0], [1], [0, 0, 1, 1], [], []>} : vector<8x64xbf16>, vector<64x64xbf16>, vector<8x64xf32> -> vector<8x64xf32>
    %c0_3 = arith.constant 0 : index
    %c0_4 = arith.constant 0 : index
    %4 = vector.load %arg3[%c0_3, %c0_4] : memref<1x64xf32, #tpu.memory_space<vmem>>, vector<1x64xf32>
    %5 = vector.broadcast %4 : vector<1x64xf32> to vector<8x64xf32>
    %6 = arith.addf %3, %5 : vector<8x64xf32>
    %cst_5 = arith.constant 0.000000e+00 : f32
    %7 = vector.broadcast %cst_5 : f32 to vector<8x64xf32>
    %8 = arith.cmpf ogt, %6, %7 : vector<8x64xf32>
    %cst_6 = arith.constant 0.00999999977 : f32
    %9 = vector.broadcast %cst_6 : f32 to vector<8x64xf32>
    %10 = arith.mulf %9, %6 : vector<8x64xf32>
    %11 = arith.select %8, %6, %10 : vector<8x64xi1>, vector<8x64xf32>
    %c0_7 = arith.constant 0 : index
    %c0_8 = arith.constant 0 : index
    %12 = vector.load %arg4[%c0_7, %c0_8] : memref<64x64xbf16, #tpu.memory_space<vmem>>, vector<64x64xbf16>
    %cst_9 = arith.constant dense<0.000000e+00> : vector<8x64xf32>
    %13 = tpu.matmul %1, %12, %cst_9 {dimension_numbers = #tpu.dot_dimension_numbers<[1], [0], [0], [1], [0, 0, 1, 1], [], []>} : vector<8x64xbf16>, vector<64x64xbf16>, vector<8x64xf32> -> vector<8x64xf32>
    %c0_10 = arith.constant 0 : index
    %c0_11 = arith.constant 0 : index
    %14 = vector.load %arg5[%c0_10, %c0_11] : memref<1x64xf32, #tpu.memory_space<vmem>>, vector<1x64xf32>
    %15 = vector.broadcast %14 : vector<1x64xf32> to vector<8x64xf32>
    %16 = arith.addf %13, %15 : vector<8x64xf32>
    %cst_12 = arith.constant 0.000000e+00 : f32
    %17 = vector.broadcast %cst_12 : f32 to vector<8x64xf32>
    %18 = arith.cmpf ogt, %16, %17 : vector<8x64xf32>
    %cst_13 = arith.constant 0.00999999977 : f32
    %19 = vector.broadcast %cst_13 : f32 to vector<8x64xf32>
    %20 = arith.mulf %19, %16 : vector<8x64xf32>
    %21 = arith.select %18, %16, %20 : vector<8x64xi1>, vector<8x64xf32>
    %22 = arith.addf %11, %21 : vector<8x64xf32>
    %23 = arith.mulf %0, %22 : vector<8x64xf32>
    %cst_14 = arith.constant dense<0.000000e+00> : vector<8xf32>
    %24 = vector.multi_reduction <add>, %23, %cst_14 [1] : vector<8x64xf32> to vector<8xf32>
    %25 = math.tanh %24 : vector<8xf32>
    %c0_15 = arith.constant 0 : index
    %c0_16 = arith.constant 0 : index
    %26 = vector.load %arg6[%c0_15, %c0_16] : memref<1x8xf32, #tpu.memory_space<vmem>>, vector<1x8xf32>
    %27 = vector.shape_cast %26 : vector<1x8xf32> to vector<8xf32>
    %28 = vector.shape_cast %25 : vector<8xf32> to vector<1x8xf32>
    tpu.vector_store %arg6[%c0_15, %c0_16], %28 {strides = array<i32>} : memref<1x8xf32, #tpu.memory_space<vmem>>, vector<1x8xf32>,
    return
  }
  func.func @transform_0(%arg0: i32) -> (i32, i32) {
    %c0_i32 = arith.constant 0 : i32
    %c0_i32_0 = arith.constant 0 : i32
    return %arg0, %c0_i32 : i32, i32
  }
  func.func @transform_1(%arg0: i32) -> (i32, i32) {
    %c0_i32 = arith.constant 0 : i32
    %c0_i32_0 = arith.constant 0 : i32
    %c0_i32_1 = arith.constant 0 : i32
    return %c0_i32, %c0_i32_0 : i32, i32
  }
  func.func @transform_2(%arg0: i32) -> (i32, i32) {
    %c0_i32 = arith.constant 0 : i32
    %c0_i32_0 = arith.constant 0 : i32
    %c0_i32_1 = arith.constant 0 : i32
    return %c0_i32, %c0_i32_0 : i32, i32
  }
  func.func @transform_3(%arg0: i32) -> (i32, i32) {
    %c0_i32 = arith.constant 0 : i32
    %c0_i32_0 = arith.constant 0 : i32
    %c0_i32_1 = arith.constant 0 : i32
    return %c0_i32, %c0_i32_0 : i32, i32
  }
  func.func @transform_4(%arg0: i32) -> (i32, i32) {
    %c0_i32 = arith.constant 0 : i32
    %c0_i32_0 = arith.constant 0 : i32
    %c0_i32_1 = arith.constant 0 : i32
    return %c0_i32, %c0_i32_0 : i32, i32
  }
  func.func @transform_5(%arg0: i32) -> (i32, i32) {
    %c0_i32 = arith.constant 0 : i32
    %c0_i32_0 = arith.constant 0 : i32
    return %arg0, %c0_i32 : i32, i32
  }
}

</mosaic_0001>

<bundles_post_ra>
// kernel: tpu_custom_call.1
= control target key start
LH: loop header
LB: loop body
LE: loop exit
PB: predicated region body
PF: predicated region fallthrough
CT: control target
= control target key end

     0   :  { %10 = vsyncpa [#allocation3], 0  ;;  %s472_s0 = inlined_call_operand.hbm [shape: f32[8,64], index: 0, kind: input, shape index: {}]   ;;  %s473_s1 = inlined_call_operand.hbm [shape: bf16[64,64], index: 1, kind: input, shape index: {}]   ;;  %s474_s2 = inlined_call_operand.vmem [shape: f32[1,64], index: 2, kind: input, shape index: {}]   ;;  %s475_s3 = inlined_call_operand.hbm [shape: bf16[64,64], index: 3, kind: input, shape index: {}]   ;;  %s476_s4 = inlined_call_operand.vmem [shape: f32[1,64], index: 4, kind: input, shape index: {}]   ;;  %s477_s5 = inlined_call_operand.hbm [shape: f32[1,8], index: 5, kind: output, shape index: {}]  }
   0x1   :  { %11 = vsyncpa [#allocation6], 0 }
   0x2   :  { %12 = vsyncpa [#allocation4], 0  ;;  %s413_s18 = smov [#allocation5]  }
   0x3   :  { %s28_s19 = sshll.u32 %s413_s18, 4  ;;  %s29_s19 = int_to_ptr.vmem [resolvable:$true] %s28_s19 }
   0x4   :  { %s335_s20 = scalar_lea.vmem %s29_s19, 512  ;;  %p340_p1 = scmp.lt.s32.totalorder %s29_s19, %s29_s19 }
   0x5   :  { %p336_p0 = scmp.ne.s32.totalorder %s29_s19, %s335_s20  ;;  %p341_p2 = scmp.lt.s32.totalorder %s335_s20, %s335_s20 }
   0x7   :  { %p342_p3 = por %p341_p2, %p340_p1 }
   0x9   :  { %p343_p4 = pnand %p342_p3, %p336_p0 }
   0xb   :  { %346 = shalt.err (!%p343_p4)
}
   0xc   :  { %s414_s21 = smov 64   ;;  %s415_s22 = smov 4  }
   0xd   :  { %34 = dma.hbm_to_vmem [thread:$0]  %s473_s1, 512, %s29_s19, [#allocation6], %s414_s21, %s414_s21, %s415_s22  }
   0xe   :  { %s416_s25 = smov [#allocation2]   ;;  %s417_s27 = smov [#allocation7]  }
   0xf   :  { %s19_s26 = sshll.u32 %s416_s25, 4  ;;  %s42_s28 = sshll.u32 %s417_s27, 4  ;;  %s20_s26 = int_to_ptr.vmem [resolvable:$true] %s19_s26  ;;  %s43_s28 = int_to_ptr.vmem [resolvable:$true] %s42_s28 }
  0x10   :  { %s355_s29 = scalar_lea.vmem %s20_s26, 128  ;;  %p360_p6 = scmp.lt.s32.totalorder %s20_s26, %s20_s26 }
  0x11   :  { %p356_p5 = scmp.ne.s32.totalorder %s20_s26, %s355_s29  ;;  %p361_p7 = scmp.lt.s32.totalorder %s355_s29, %s355_s29 }
  0x13   :  { %p362_p8 = por %p361_p7, %p360_p6 }
  0x15   :  { %p363_p9 = pnand %p362_p8, %p356_p5 }
  0x17   :  { %366 = shalt.err (!%p363_p9)
}
  0x18   :  { %22 = dma.hbm_to_vmem [thread:$0]  %s472_s0, 128, %s20_s26, [#allocation3]  }
  0x19   :  { %s375_s7 = scalar_lea.vmem %s43_s28, 512  ;;  %p380_p11 = scmp.lt.s32.totalorder %s43_s28, %s43_s28 }
  0x1a   :  { %p376_p10 = scmp.ne.s32.totalorder %s43_s28, %s375_s7  ;;  %p381_p12 = scmp.lt.s32.totalorder %s375_s7, %s375_s7 }
  0x1c   :  { %p382_p13 = por %p381_p12, %p380_p11 }
  0x1e   :  { %p383_p0 = pnand %p382_p13, %p376_p10 }
  0x20   :  { %386 = shalt.err (!%p383_p0)
}
  0x21   :  { %48 = dma.hbm_to_vmem [thread:$0]  %s475_s3, 512, %s43_s28, [#allocation6], %s414_s21, %s414_s21, %s415_s22  }
  0x22   :  { %407 = dma.done.wait [#allocation3], 128  }
  0x23   :  { %408 = vsyncadd [#allocation3], 4294967168 }
  0x24   :  { %409 = dma.done.wait [#allocation6], 1024  }
  0x25   :  { %410 = vsyncadd [#allocation6], 4294966272  ;;  %v418_v0 = vmov 0.0   ;;  %vm419_vm0 = vmmov 0   ;;  %v317_v1 = vld [vmem:[#allocation5 + $0x18] sm:$0xff]   ;;  %v319_v3 = vld [vmem:[#allocation5 + $0x10] sm:$0xff]   ;;  %v238_v31 = vlaneseq }
  0x26   :  { %285 = vmatprep.subr.bf16.mxu0 %v418_v0  ;;  %297 = vmatprep.subr.bf16.mxu1 %v418_v0  ;;  %v318_v2 = vld [vmem:[#allocation7 + $0x18] sm:$0xff]   ;;  %v320_v4 = vld [vmem:[#allocation7 + $0x10] sm:$0xff]   ;;  %v321_v5 = vld [vmem:[#allocation5 + $0x8] sm:$0xff]   ;;  %vm102_vm1 = vcmask 523264   ;;  %vm245_vm4 = vcmask 57344  }
  0x27   :  { %293 = vmatprep.mubr.msk.bf16.mxu0 %vm419_vm0, %v418_v0  ;;  %305 = vmatprep.mubr.msk.bf16.mxu1 %vm419_vm0, %v418_v0  ;;  %v322_v6 = vld [vmem:[#allocation7 + $0x8] sm:$0xff]   ;;  %v323_v7 = vld [vmem:[#allocation5] sm:$0xff]   ;;  %v61_v8 = vld [vmem:[#allocation2] sm:$0xff]  ;;  %v239_v32 = vand.u32 127, %v238_v31  ;;  %v241_v33 = vshrl.u32 %v238_v31, 7 }
  0x28   :  { %286 = vmatpush3.bf16.msra.mxu0 %v317_v1  ;;  %298 = vmatpush3.bf16.msra.mxu1 %v318_v2  ;;  %v324_v9 = vld [vmem:[#allocation7] sm:$0xff]   ;;  %v62_v10 = vpack.c.bf16 %v61_v8, %v61_v8  ;;  %v263_v11 = vld [vmem:[%s474_s2] ss:$0 sm:$0xff]  ;;  %s420_s2 = smov [#allocation8]  }
  0x29   :  { %287 = vmatprep.subr.bf16.mxu0 %v418_v0  ;;  %299 = vmatprep.subr.bf16.mxu1 %v418_v0  ;;  %v269_v12 = vld [vmem:[%s476_s4] ss:$0 sm:$0xff]  ;;  %v242_v34 = vsub.s32 %v239_v32, %v241_v33  ;;  %s253_s4 = sshll.u32 %s420_s2, 4  ;;  %s254_s4 = int_to_ptr.vmem [resolvable:$true] %s253_s4 }
  0x2a   :  { %s387_s11 = scalar_lea.vmem %s254_s4, 16  ;;  %s391_s12 = scalar_lea.vmem %s254_s4, 32 }
  0x2b   :  { %p388_p1 = scmp.ne.s32.totalorder %s254_s4, %s387_s11  ;;  %p392_p2 = scmp.lt.s32.totalorder %s254_s4, %s254_s4 }
  0x2c   :  { %288 = vmatpush3.bf16.msra.mxu0 %v319_v3  ;;  %300 = vmatpush3.bf16.msra.mxu1 %v320_v4  ;;  %p393_p3 = scmp.lt.s32.totalorder %s391_s12, %s387_s11 }
  0x2d   :  { %289 = vmatprep.subr.bf16.mxu0 %v418_v0  ;;  %301 = vmatprep.subr.bf16.mxu1 %v418_v0 }
  0x2e   :  { %p394_p4 = por %p393_p3, %p392_p2 }
  0x30   :  { %290 = vmatpush3.bf16.msra.mxu0 %v321_v5  ;;  %302 = vmatpush3.bf16.msra.mxu1 %v322_v6  ;;  %p395_p5 = pnand %p394_p4, %p388_p1 }
  0x31   :  { %291 = vmatprep.subr.bf16.mxu0 %v418_v0  ;;  %303 = vmatprep.subr.bf16.mxu1 %v418_v0 }
  0x34   :  { %292 = vmatpush3.bf16.msra.mxu0 %v323_v7  ;;  %304 = vmatpush3.bf16.msra.mxu1 %v324_v9 }
  0x37   :  { %294 = vmatmul.mubr.msk.bf16.vlgmr.msra.gmra.mxu0 %vm102_vm1, %v62_v10  ;;  %306 = vmatmul.mubr.msk.bf16.vlgmr.msra.gmra.mxu1 %vm102_vm1, %v62_v10 }
  0xf7   :  { %v140_v13 = vpop.f32.mrf.mxu0  ;;  %v222_v15 = vpop.f32.mrf.mxu1 }
  0xf8   :  { %v141_v14 = vadd.f32 %v263_v11, %v140_v13  ;;  %v223_v16 = vadd.f32 %v269_v12, %v222_v15 }
  0xf9   :  { %v295_v17 = vpop.f32.mrf.mxu0  ;;  %v307_v19 = vpop.f32.mrf.mxu1 }
  0xfa   :  { %vm146_vm2 = vcmp.gt.f32.partialorder %v141_v14, 0.0  ;;  %v147_v18 = vmul.f32 0.01, %v141_v14  ;;  %vm228_vm3 = vcmp.gt.f32.partialorder %v223_v16, 0.0  ;;  %v229_v20 = vmul.f32 0.01, %v223_v16 }
  0xfb   :  { %v143_v21 = vpop.f32.mrf.mxu0  ;;  %v225_v22 = vpop.f32.mrf.mxu1 }
  0xfc   :  { %v148_v23 = vsel %vm146_vm2, %v141_v14, %v147_v18  ;;  %v230_v25 = vsel %vm228_vm3, %v223_v16, %v229_v20 }
  0xfd   :  { %v296_v24 = vpop.f32.mrf.mxu0  ;;  %v308_v26 = vpop.f32.mrf.mxu1  ;;  %v231_v27 = vadd.f32 %v230_v25, %v148_v23 }
  0xff   :  { %v232_v28 = vmul.f32 %v231_v27, %v61_v8 }
 0x101   :  { %v233_v29 = vsel %vm102_vm1, %v232_v28, 0.0 }
 0x102   :  { %234 = vadd.xlane.f32.xlu0 %v233_v29 }
 0x18b   :  { %v235_v30 = vpop.xlane.xlu0 %234 }
 0x18c   :  { %325 = vtanh.f32 %v235_v30 }
 0x199   :  { %v326_v35 = vpop.eup %325 }
 0x19a   :  { %v243_v36 = vrot.slane %v326_v35, %v242_v34 }
 0x19c   :  { %246 = vst.msk [vmem:[#allocation8] sm:$0x1] %vm245_vm4, %v243_v36 }
 0x19d   :  { %398 = shalt.err (!%p395_p5)
}
 0x19e   :  { %256 = dma.vmem_to_hbm [thread:$0]  %s254_s4, 16, %s477_s5, [#allocation4]  }
 0x19f   :  { %411 = dma.done.wait [#allocation4], 16  }
 0x1a0   :  { %412 = vsyncadd [#allocation4], 4294967280 }
 0x1a1   :  { %260 = vsyncpa [#allocation3], 1 }
 0x1a2   :  { %261 = vsyncpa [#allocation6], 1 }
 0x1a3   :  { %262 = vsyncpa [#allocation4], 1 }

</bundles_post_ra>
